<compile_context>
chip_gen: v5e
topology: v5e:2x2
jax: 0.10.0
libtpu: 0.0.40
codegen_flags: <defaults>
</compile_context>

<pallas_src>
import functools

import jax
import jax.numpy as jnp
from jax.experimental import pallas as pl
from jax.experimental.pallas import tpu as pltpu


# ----------------------------------------------------------------------------
# One-time probe: does pltpu.roll follow jnp.roll's convention?
# (result[i] = x[(i - shift) % N]).  Resolved at trace time, cached.
# ----------------------------------------------------------------------------
@functools.lru_cache(maxsize=1)
def _roll_matches_jnp_roll():
    def probe_kernel(x_ref, o_ref):
        o_ref[...] = pltpu.roll(x_ref[...], 1, 1)

    x = jnp.arange(8 * 128, dtype=jnp.float32).reshape(8, 128)
    y = pl.pallas_call(
        probe_kernel,
        out_shape=jax.ShapeDtypeStruct((8, 128), jnp.float32),
    )(x)
    # jnp.roll(x, 1, axis=1)[0, 0] == x[0, 127] == 127.0
    return bool(y[0, 0] == 127.0)


_OFFSETS = tuple((oy, ox) for oy in (-1, 0, 1) for ox in (-1, 0, 1))


# ----------------------------------------------------------------------------
# Fused FFDNet forward kernel (one lane-fused batch slab per grid step)
# ----------------------------------------------------------------------------
def _ffdnet_kernel(masks1_ref, masksf_ref, img_ref, *refs, W, L, roll_is_jnp,
                   meta_b, meta_l, meta_f, include_l):
    # masks1_ref: (9, L)        tap-validity masks (row per 3x3 tap)
    # masksf_ref: (9, maxc, L)  same masks, pre-broadcast to feature width
    # img_ref:    (1, L)        image(s), channels-first, spatial+batch on lanes
    # refs:       per-layer (w, b) parameter refs followed by the output ref
    out_ref = refs[-1]
    prm = refs[:-1]

    def lane_shift(s):
        return ((-s) % L) if roll_is_jnp else (s % L)

    def conv_small(rows, w_ref, b_ref, cout, relu):
        # Cin <= 2: per-(tap, channel) VPU outer-product accumulation.
        # w_ref: (9*Cin, Cout, 1); rows: list of (1, L) channel rows.
        cin = len(rows)
        acc = jnp.broadcast_to(b_ref[...], (cout, L))          # bias-seeded
        for t, (oy, ox) in enumerate(_OFFSETS):
            s = oy * W + ox
            if s == 0:
                for c in range(cin):
                    acc = acc + w_ref[t * cin + c] * rows[c]
            else:
                m = masks1_ref[t:t + 1, :]                     # (1, L)
                sh = lane_shift(s)
                for c in range(cin):
                    r = pltpu.roll(rows[c], sh, 1) * m
                    acc = acc + w_ref[t * cin + c] * r         # (Cout,1)*(1,L)
        return jnp.maximum(acc, 0.0) if relu else acc

    def conv_big(a, w_ref, b_ref, cin, cout, relu):
        # Cin == features: 9 accumulating MXU matmuls with K = Cin each; the
        # XLU roll/mask of tap t+1 overlaps the MXU matmul of tap t.
        # w_ref: (9, Cout, Cin); a: (Cin, L).
        acc = jnp.broadcast_to(b_ref[...], (cout, L))          # bias-seeded
        for t, (oy, ox) in enumerate(_OFFSETS):
            s = oy * W + ox
            if s == 0:
                sh = a                                          # center tap
            else:
                m = masksf_ref[t]                               # (maxc, L)
                if cin != m.shape[0]:
                    m = m[:cin, :]
                sh = pltpu.roll(a, lane_shift(s), 1) * m
            acc = acc + jnp.dot(w_ref[t], sh,
                                preferred_element_type=jnp.float32)
        return jnp.maximum(acc, 0.0) if relu else acc

    def run_branch(rows, base, meta):
        a = None
        for li, (cin, cout, relu) in enumerate(meta):
            w_ref = prm[base + 2 * li]
            b_ref = prm[base + 2 * li + 1]
            if li == 0:
                if cin <= 2:
                    a = conv_small(rows, w_ref, b_ref, cout, relu)
                else:
                    a = conv_big(jnp.concatenate(rows, axis=0), w_ref, b_ref,
                                 cin, cout, relu)
            else:
                a = conv_big(a, w_ref, b_ref, cin, cout, relu)
        return a

    img = img_ref[...]                              # (1, L)

    braw = run_branch([img], 0, meta_b)             # DnCNN_B(image) -> (1, L)
    v = img - braw

    if include_l:
        lraw = run_branch([img], 2 * len(meta_b), meta_l)
        lmax = jnp.max(lraw, axis=0, keepdims=True)
        le = jnp.exp(lraw - lmax)
        l = img * (le / jnp.sum(le, axis=0, keepdims=True))
        l_rows = [l[c:c + 1, :] for c in range(l.shape[0])]
        f_base = 2 * (len(meta_b) + len(meta_l))
    else:
        # Channel-softmax of DnCNN_L's single output channel is identically
        # 1.0, so l = image * 1 = image.  Skipping the whole L branch is
        # bit-exact.
        l_rows = [img]
        f_base = 2 * len(meta_b)

    fraw = run_branch([v] + l_rows, f_base, meta_f)  # DnCNN_F([v, l])
    out_ref[...] = v - fraw


# ----------------------------------------------------------------------------
# Host-side helpers: masks, weight packing, grid selection, wrapper
# ----------------------------------------------------------------------------
def _make_tap_masks(H, W):
    ys = jnp.arange(H).reshape(H, 1)
    xs = jnp.arange(W).reshape(1, W)
    rows = []
    for oy, ox in _OFFSETS:
        valid = ((ys + oy >= 0) & (ys + oy < H) &
                 (xs + ox >= 0) & (xs + ox < W))
        rows.append(valid.reshape(-1))
    return jnp.stack(rows, axis=0).astype(jnp.float32)     # (9, H*W)


def _pack_layer(w, b):
    """HWIO (3,3,Cin,Cout) conv weights -> per-tap kernel layouts."""
    _, _, cin, cout = w.shape
    if cin <= 2:
        # (9*Cin, Cout, 1): leading index t*Cin + c -> one (Cout, 1) column.
        wp = w.reshape(9, cin, cout).reshape(9 * cin, cout)[:, :, None]
    else:
        # (9, Cout, Cin): leading index t -> one (Cout, Cin) tap matrix.
        wp = jnp.transpose(w, (0, 1, 3, 2)).reshape(9, cout, cin)
    return (wp.astype(jnp.float32),
            b.reshape(cout, 1).astype(jnp.float32), int(cin), int(cout))


def _parallel_grid_steps(n):
    """Grid steps kept 'parallel' so multi-TensorCore chips stay busy.

    v7x has 2 TensorCores per chip (v4 megacore likewise), so keep 2 parallel
    grid steps there; single-TC chips (v5e/v6e) get one grid step with the
    whole batch fused into the lane axis (halves step overhead and doubles
    per-op lane occupancy).
    """
    if n < 2:
        return 1
    try:
        kind = jax.devices()[0].device_kind.lower()
    except Exception:
        kind = ""
    two_tc = any(tag in kind for tag in ("v7", "v4"))
    g = 2 if two_tc else 1
    return g if n % g == 0 else 1


def ffdnet_forward(img_nchw, params_b, params_l, params_f):
    """img_nchw: (N, 1, H, W) f32.  Returns (N, 1, H, W) f32."""
    N, C, H, W = img_nchw.shape
    if C != 1:
        raise ValueError("FFDNet takes a single-channel image")
    S = H * W

    # Batch layout: G parallel grid steps, N // G images fused into lanes each.
    G = _parallel_grid_steps(N)
    Nb = N // G
    L = Nb * S

    img = (img_nchw.astype(jnp.float32)
           .reshape(G, Nb, 1, S).transpose(0, 2, 1, 3).reshape(G, 1, L))

    # Softmax over a single output channel is identically 1 => DnCNN_L is
    # dead compute; skip it (bit-exact) whenever its last conv has Cout == 1.
    include_l = int(params_l[-1][0].shape[3]) != 1

    branches = ([params_b, params_l, params_f] if include_l
                else [params_b, params_f])
    flat_params, metas = [], []
    for branch in branches:
        meta = []
        for (w, b, relu) in branch:
            wp, bp, cin, cout = _pack_layer(w, b)
            flat_params += [wp, bp]
            meta.append((cin, cout, bool(relu)))
        metas.append(tuple(meta))
    if include_l:
        meta_b, meta_l, meta_f = metas
    else:
        meta_b, meta_f = metas
        meta_l = ()

    # Tap-validity masks: (9, L) rows for the Cin<=2 convs, plus a host-side
    # pre-broadcast (9, maxc, L) copy for the feature-width convs so the
    # kernel never re-emits mask broadcasts.
    maxc = max([cin for m in metas for (cin, _, _) in m if cin > 2] + [1])
    masks1 = jnp.tile(_make_tap_masks(H, W), (1, Nb))                 # (9, L)
    masksf = jnp.broadcast_to(masks1[:, None, :], (9, maxc, L))       # (9, maxc, L)

    kernel = functools.partial(
        _ffdnet_kernel, W=W, L=L, roll_is_jnp=_roll_matches_jnp_roll(),
        meta_b=meta_b, meta_l=meta_l, meta_f=meta_f, include_l=include_l)

    img_spec = pl.BlockSpec((pl.Squeezed(), 1, L), lambda g: (g, 0, 0))
    out_spec = pl.BlockSpec((pl.Squeezed(), 1, L), lambda g: (g, 0, 0))
    in_specs = [pl.BlockSpec((9, L), lambda g: (0, 0)),
                pl.BlockSpec((9, maxc, L), lambda g: (0, 0, 0)),
                img_spec]
    for p in flat_params:
        in_specs.append(pl.BlockSpec(p.shape, lambda g, nd=p.ndim: (0,) * nd))

    out = pl.pallas_call(
        kernel,
        out_shape=jax.ShapeDtypeStruct((G, 1, L), jnp.float32),
        grid_spec=pltpu.PrefetchScalarGridSpec(
            num_scalar_prefetch=0,
            grid=(G,),
            in_specs=in_specs,
            out_specs=out_spec,
        ),
        compiler_params=pltpu.CompilerParams(
            dimension_semantics=("parallel",)),
    )(masks1, masksf, img, *flat_params)

    # TODO(synk): for realistic image sizes add a spatial row-block grid axis
    # with a 1-row halo (and set vmem_limit_bytes explicitly, esp. on v7x's
    # 64 MiB VMEM); at 16x16 the whole working set is < 1 MiB so no spatial
    # tiling is needed.
    return (out.reshape(G, 1, Nb, S).transpose(0, 2, 1, 3)
            .reshape(N, 1, H, W))


# ----------------------------------------------------------------------------
# Parameter construction (deterministic, synthetic) + BN folding
# ----------------------------------------------------------------------------
def _conv_init(key, cin, cout):
    k1, k2 = jax.random.split(key)
    bound = 1.0 / float((cin * 9) ** 0.5)
    w = jax.random.uniform(k1, (3, 3, cin, cout), jnp.float32, -bound, bound)
    b = jax.random.uniform(k2, (cout,), jnp.float32, -bound, bound)
    return w, b


def _bn_init(key, c):
    k1, k2, k3, k4 = jax.random.split(key, 4)
    gamma = 1.0 + 0.1 * jax.random.normal(k1, (c,), jnp.float32)
    beta = 0.1 * jax.random.normal(k2, (c,), jnp.float32)
    mean = 0.1 * jax.random.normal(k3, (c,), jnp.float32)
    var = jnp.abs(1.0 + 0.1 * jax.random.normal(k4, (c,), jnp.float32))
    return gamma, beta, mean, var


def _fold_bn(w, b, gamma, beta, mean, var, eps=1e-5):
    # TODO(synk): BatchNorm2d reproduced in eval mode (running stats); the
    # training-mode batch-statistics path is not implemented.
    scale = gamma / jnp.sqrt(var + eps)
    w2 = w * scale[None, None, None, :]
    b2 = (b - mean) * scale + beta
    return w2, b2


def make_branch(key, cin, features):
    """Returns list of (w, b, relu_flag) for the 4 conv layers of one DnCNN."""
    ks = jax.random.split(key, 6)
    w1, b1 = _conv_init(ks[0], cin, features)
    w2, b2 = _conv_init(ks[1], features, features)
    w2, b2 = _fold_bn(w2, b2, *_bn_init(ks[2], features))
    w3, b3 = _conv_init(ks[3], features, features)
    w3, b3 = _fold_bn(w3, b3, *_bn_init(ks[4], features))
    w4, b4 = _conv_init(ks[5], features, 1)
    return [(w1, b1, True), (w2, b2, True), (w3, b3, True), (w4, b4, False)]


# ----------------------------------------------------------------------------
# Pure-JAX reference for verification (NHWC, includes the full L branch)
# ----------------------------------------------------------------------------
def _ref_conv(x, w, b, relu):
    y = jax.lax.conv_general_dilated(
        x, w, window_strides=(1, 1), padding="SAME",
        dimension_numbers=("NHWC", "HWIO", "NHWC")) + b
    return jnp.maximum(y, 0.0) if relu else y


def _ref_branch(x, layers):
    for (w, b, relu) in layers:
        x = _ref_conv(x, w, b, relu)
    return x


def ref_forward(img_nhwc, params_b, params_l, params_f):
    v = img_nhwc - _ref_branch(img_nhwc, params_b)
    l = img_nhwc * jax.nn.softmax(_ref_branch(img_nhwc, params_l), axis=-1)
    t = jnp.concatenate([v, l], axis=-1)
    return v - _ref_branch(t, params_f)


# ----------------------------------------------------------------------------
if __name__ == "__main__":
    key = jax.random.PRNGKey(0)
    k_img, k_params = jax.random.split(key)

    # PyTorch-convention input: NCHW (2, 1, 16, 16)
    img_nchw = jax.random.normal(k_img, (2, 1, 16, 16), dtype=jnp.float32)

    kb, kl, kf = jax.random.split(k_params, 3)
    features = 16
    params_b = make_branch(kb, 1, features)
    params_l = make_branch(kl, 1, features)
    params_f = make_branch(kf, 2, features)

    out = ffdnet_forward(img_nchw, params_b, params_l, params_f)
    out = jax.block_until_ready(out)

    img_nhwc = jnp.transpose(img_nchw, (0, 2, 3, 1))
    ref_nhwc = ref_forward(img_nhwc, params_b, params_l, params_f)
    ref = jnp.transpose(ref_nhwc, (0, 3, 1, 2))

    assert out.shape == (2, 1, 16, 16) and out.dtype == jnp.float32
    err = float(jnp.max(jnp.abs(out - ref)))
    assert jnp.allclose(out, ref, atol=2e-3, rtol=2e-3), err

    print("KERNEL_OK")
</pallas_src>

<mosaic_0001>
module attributes {stable_mosaic.version = 11 : i64} {
  func.func @probe_kernel(%arg0: memref<8x128xf32, #tpu.memory_space<vmem>>, %arg1: memref<8x128xf32, #tpu.memory_space<vmem>>) attributes {dimension_semantics = [], scalar_prefetch = 0 : i64, scratch_operands = 0 : i64, tpu.core_type = #tpu.core_type<tc>} {
    %c0 = arith.constant 0 : index
    %c0_0 = arith.constant 0 : index
    %0 = vector.load %arg0[%c0, %c0_0] : memref<8x128xf32, #tpu.memory_space<vmem>>, vector<8x128xf32>
    %c1_i32 = arith.constant 1 : i32
    %1 = tpu.dynamic_rotate %0 by %c1_i32 dim 1 : vector<8x128xf32>, i32 -> vector<8x128xf32>
    %c0_1 = arith.constant 0 : index
    %c0_2 = arith.constant 0 : index
    %2 = vector.load %arg1[%c0_1, %c0_2] : memref<8x128xf32, #tpu.memory_space<vmem>>, vector<8x128xf32>
    tpu.vector_store %arg1[%c0_1, %c0_2], %1 {strides = array<i32>} : memref<8x128xf32, #tpu.memory_space<vmem>>, vector<8x128xf32>,
    return
  }
}

</mosaic_0001>

<bundles_post_ra>
// kernel: tpu_custom_call.1
= control target key start
LH: loop header
LB: loop body
LE: loop exit
PB: predicated region body
PF: predicated region fallthrough
CT: control target
= control target key end

     0   :  { %6 = vsyncpa [#allocation3], 0  ;;  %s118_s0 = inlined_call_operand.hbm [shape: f32[8,128], index: 0, kind: input, shape index: {}]   ;;  %s119_s1 = inlined_call_operand.hbm [shape: f32[8,128], index: 1, kind: output, shape index: {}]  }
   0x1   :  { %7 = vsyncpa [#allocation4], 0  ;;  %s13_s8 = sshll.u32 %s118_s0, 4  ;;  %s99_s9 = smov [#allocation2]   ;;  %s14_s8 = int_to_ptr.hbm [resolvable:$true] %s13_s8 }
   0x2   :  { %s15_s10 = sshll.u32 %s99_s9, 4  ;;  %s16_s10 = int_to_ptr.vmem [resolvable:$true] %s15_s10 }
   0x3   :  { %18 = dma.hbm_to_vmem [thread:$0]  %s14_s8, 128, %s16_s10, [#allocation3]  }
   0x4   :  { %95 = dma.done.wait [#allocation3], 128  }
   0x5   :  { %96 = vsyncadd [#allocation3], 4294967168  ;;  %v23_v0 = vld [vmem:[#allocation2] sm:$0xff]  ;;  %s100_s11 = smov 1   ;;  %s101_s12 = smov [#allocation5]  }
   0x6   :  { %24 = vrot.lane.b32.xlu0 %v23_v0, %s100_s11  ;;  %s32_s13 = sshll.u32 %s101_s12, 4  ;;  %s34_s16 = sshll.u32 %s119_s1, 4  ;;  %s33_s13 = int_to_ptr.vmem [resolvable:$true] %s32_s13  ;;  %s35_s16 = int_to_ptr.hbm [resolvable:$true] %s34_s16 }
  0x78   :  { %v25_v1 = vpop.permute.xlu0 %24 }
  0x79   :  { %26 = vst [vmem:[#allocation5] sm:$0xff] %v25_v1 }
  0x7a   :  { %37 = dma.vmem_to_hbm [thread:$0]  %s33_s13, 128, %s35_s16, [#allocation4]  }
  0x7b   :  { %97 = dma.done.wait [#allocation4], 128  }
  0x7c   :  { %98 = vsyncadd [#allocation4], 4294967168 }
  0x7d   :  { %42 = vsyncpa [#allocation3], 1 }
  0x7e   :  { %43 = vsyncpa [#allocation4], 1 }

</bundles_post_ra>
